<compile_context>
chip_gen: v7x
topology: tpu7x:2x2x1
jax: 0.10.0
libtpu: 0.0.40
codegen_flags: <defaults>
</compile_context>

<pallas_src>
import functools

import jax
import jax.numpy as jnp
from jax.experimental import pallas as pl
from jax.experimental.pallas import tpu as pltpu

O_DIM = 32          # observation dim
A_DIM = 8           # action dim
HID = 128           # hidden width (fixed by the module)
BATCH = 8           # example batch
EPS = 1e-5          # nn.LayerNorm default eps
MAX_TILE_B = 2048   # batch tile cap (amortizes ~0.35us/step grid overhead)
SPLIT_ROWS = 1024   # force >=2 grid steps once this many rows exist (v7x megacore)


def _round_up(x, m):
    return (x + m - 1) // m * m


def _cdiv(a, b):
    return -(-a // b)


def _pick_tanh_dtype():
    """bf16 tanh only on generations with a bf16 EUP (v6e / v7x); f32 otherwise."""
    kind = jax.devices()[0].device_kind.lower()
    if ("v6" in kind) or ("v7" in kind) or ("7x" in kind):
        return jnp.bfloat16
    return jnp.float32


# ----------------------------------------------------------------------------- kernel


def policy_kernel(obs_ref, bias_ref, w_ref, out_ref, *, tanh_dtype):
    o_dim = obs_ref.shape[-1]
    a_dim = out_ref.shape[-1]

    c1 = bias_ref[0:1, :]      # folded biases: c' = c + beta @ W  (f32)
    c2 = bias_ref[1:2, :]
    c3 = bias_ref[2:3, :]

    def norm(x):
        # LayerNorm without affine (affine folded into the next linear).
        # Single-pass stats: both XLU reductions issue directly off x.
        mu = jnp.mean(x, axis=-1, keepdims=True)
        ms = jnp.mean(x * x, axis=-1, keepdims=True)
        var = jnp.maximum(ms - mu * mu, 0.0)
        return (x - mu) * jax.lax.rsqrt(var + EPS)

    def tanh(v):
        return jnp.tanh(v.astype(tanh_dtype))

    x = obs_ref[...].astype(jnp.float32)

    # Block 1: norm -> Linear(o_dim, 128) -> tanh.  w slab row 0 is w1 zero-padded
    # on K; the [:o_dim] view is sublane-tile aligned (o_dim=32, bf16 tile=16).
    h = norm(x).astype(jnp.bfloat16)
    h = tanh(jnp.dot(h, w_ref[0][:o_dim, :],
                     preferred_element_type=jnp.float32) + c1).astype(jnp.float32)

    # Block 2: norm -> Linear(128, 128) -> tanh.
    h = norm(h).astype(jnp.bfloat16)
    h = tanh(jnp.dot(h, w_ref[1],
                     preferred_element_type=jnp.float32) + c2).astype(jnp.float32)

    # Block 3: norm -> Linear(128, a_dim) -> tanh.  w3 is lane-padded inside the
    # slab (same vreg count either way); only the first a_dim lanes are stored.
    h = norm(h).astype(jnp.bfloat16)
    y = tanh(jnp.dot(h, w_ref[2],
                     preferred_element_type=jnp.float32) + c3)
    out_ref[...] = y[:, :a_dim].astype(out_ref.dtype)


# ----------------------------------------------------------------------------- packing


def pack_params(p):
    """Fold LN affine into the following linear and pack into two slabs (do once)."""
    o_dim = p["w1"].shape[0]
    a_dim = p["w3"].shape[1]
    assert o_dim <= HID and a_dim <= HID

    def fold(g, b, w, c):
        # (norm(x)*g + b) @ W + c == norm(x) @ (diag(g) W) + (b @ W + c)
        w = w.astype(jnp.float32)
        c = c.reshape(1, -1).astype(jnp.float32)
        g = g.reshape(-1).astype(jnp.float32)
        b = b.reshape(-1).astype(jnp.float32)
        return g[:, None] * w, c + b @ w

    w1f, c1f = fold(p["g0"], p["b0"], p["w1"], p["c1"])
    w2f, c2f = fold(p["g1"], p["b1"], p["w2"], p["c2"])
    w3f, c3f = fold(p["g2"], p["b2"], p["w3"], p["c3"])

    def pad2(w):  # zero-pad to (HID, HID)
        return jnp.pad(w, ((0, HID - w.shape[0]), (0, HID - w.shape[1])))

    def pad_row(c):  # zero-pad to (1, HID)
        return jnp.pad(c, ((0, 0), (0, HID - c.shape[1])))

    w_slab = jnp.stack([pad2(w1f), pad2(w2f), pad2(w3f)]).astype(jnp.bfloat16)  # (3,128,128)
    bias_slab = jnp.concatenate([pad_row(c1f), pad_row(c2f), pad_row(c3f)],
                                axis=0).astype(jnp.float32)                      # (3,128)
    return {"w": w_slab, "bias": bias_slab, "o_dim": o_dim, "a_dim": a_dim}


# ----------------------------------------------------------------------------- wrapper


def _choose_tiles(B):
    """Tight tiling: big tiles, >=2 steps when there is enough work, minimal padding."""
    B8 = _round_up(B, 8)
    if B8 > MAX_TILE_B:
        n_tiles = _cdiv(B8, MAX_TILE_B)
    elif B8 >= SPLIT_ROWS:
        n_tiles = 2            # keep both v7x TensorCores busy
    else:
        n_tiles = 1
    tile_b = _round_up(_cdiv(B8, n_tiles), 8)
    return tile_b, n_tiles * tile_b, n_tiles


def deterministic_policy(obs, packed, tanh_dtype=None):
    """Returns bf16 actions of shape (B, a_dim)."""
    B, o_dim = obs.shape
    a_dim = packed["a_dim"]
    if tanh_dtype is None:
        tanh_dtype = _pick_tanh_dtype()

    tile_b, B_pad, n_tiles = _choose_tiles(B)
    if B_pad != B:
        obs = jnp.pad(obs, ((0, B_pad - B), (0, 0)))   # zero rows -> finite, sliced off

    kernel = functools.partial(policy_kernel, tanh_dtype=tanh_dtype)
    out = pl.pallas_call(
        kernel,
        out_shape=jax.ShapeDtypeStruct((B_pad, a_dim), jnp.bfloat16),
        grid=(n_tiles,),
        in_specs=[
            pl.BlockSpec((tile_b, o_dim), lambda i: (i, 0)),       # obs: pipelined per tile
            pl.BlockSpec((3, HID), lambda i: (0, 0)),              # folded biases: resident
            pl.BlockSpec((3, HID, HID), lambda i: (0, 0, 0)),      # w1|w2|w3 slab: resident
        ],
        out_specs=pl.BlockSpec((tile_b, a_dim), lambda i: (i, 0)),  # a_dim-wide bf16 store
        compiler_params=pltpu.CompilerParams(
            dimension_semantics=("parallel",)),                     # megacore on v7x
    )(obs, packed["bias"], packed["w"])

    # Only a (possibly no-op) row slice remains; lanes are already a_dim wide.
    return out[:B]


# ----------------------------------------------------------------------------- reference


def init_params(key, o_dim, a_dim):
    ks = jax.random.split(key, 3)

    def linear(k, fan_in, fan_out):
        # PyTorch nn.Linear default init: U(-1/sqrt(fan_in), 1/sqrt(fan_in))
        bound = 1.0 / jnp.sqrt(fan_in)
        kw, kb = jax.random.split(k)
        w = jax.random.uniform(kw, (fan_in, fan_out), jnp.float32, -bound, bound)
        b = jax.random.uniform(kb, (1, fan_out), jnp.float32, -bound, bound)
        return w, b

    w1, c1 = linear(ks[0], o_dim, HID)
    w2, c2 = linear(ks[1], HID, HID)
    w3, c3 = linear(ks[2], HID, a_dim)
    return {
        # nn.LayerNorm default affine init (weight=1, bias=0)
        "g0": jnp.ones((1, o_dim), jnp.float32), "b0": jnp.zeros((1, o_dim), jnp.float32),
        "g1": jnp.ones((1, HID), jnp.float32),   "b1": jnp.zeros((1, HID), jnp.float32),
        "g2": jnp.ones((1, HID), jnp.float32),   "b2": jnp.zeros((1, HID), jnp.float32),
        "w1": w1, "c1": c1, "w2": w2, "c2": c2, "w3": w3, "c3": c3,
    }


def reference(obs, p, tanh_dtype):
    """Faithful module math with the kernel's precision choices (bf16 MXU, f32 acc)."""
    def dot_bf16(x, w):
        return jnp.dot(x.astype(jnp.bfloat16), w.astype(jnp.bfloat16),
                       preferred_element_type=jnp.float32)

    def ln(x, g, b):
        mu = jnp.mean(x, axis=-1, keepdims=True)
        var = jnp.mean((x - mu) ** 2, axis=-1, keepdims=True)
        return (x - mu) * jax.lax.rsqrt(var + EPS) * g + b

    def tanh(x):
        return jnp.tanh(x.astype(tanh_dtype)).astype(jnp.float32)

    h = tanh(dot_bf16(ln(obs, p["g0"], p["b0"]), p["w1"]) + p["c1"])
    h = tanh(dot_bf16(ln(h, p["g1"], p["b1"]), p["w2"]) + p["c2"])
    return tanh(dot_bf16(ln(h, p["g2"], p["b2"]), p["w3"]) + p["c3"])


if __name__ == "__main__":
    key = jax.random.PRNGKey(0)
    k_obs, k_par = jax.random.split(key)
    obs = jax.random.normal(k_obs, (BATCH, O_DIM), jnp.float32)
    params = init_params(k_par, O_DIM, A_DIM)

    packed = pack_params(params)           # pack once; reuse across calls
    tanh_dtype = _pick_tanh_dtype()

    action = deterministic_policy(obs, packed, tanh_dtype=tanh_dtype)
    action = jax.block_until_ready(action)
    assert action.shape == (BATCH, A_DIM)

    ref = reference(obs, params, tanh_dtype).astype(jnp.bfloat16)
    err = float(jnp.max(jnp.abs(action.astype(jnp.float32) - ref.astype(jnp.float32))))
    # bf16 output (and, on v6e/v7x, bf16 EUP tanh) sets the achievable tolerance.
    tol = 3e-2 if tanh_dtype == jnp.bfloat16 else 5e-3
    assert err < tol, f"mismatch vs JAX reference: {err}"

    print("KERNEL_OK")
</pallas_src>

<mosaic_0001>
module attributes {stable_mosaic.version = 11 : i64} {
  func.func @policy_kernel(%arg0: i32, %arg1: memref<8x32xf32, #tpu.memory_space<vmem>>, %arg2: memref<3x128xf32, #tpu.memory_space<vmem>>, %arg3: memref<3x128x128xbf16, #tpu.memory_space<vmem>>, %arg4: memref<8x8xbf16, #tpu.memory_space<vmem>>) attributes {dimension_semantics = [#tpu.dimension_semantics<parallel>], iteration_bounds = array<i64: 1>, scalar_prefetch = 0 : i64, scratch_operands = 0 : i64, tpu.core_type = #tpu.core_type<tc>, window_params = [{transform_indices = @transform_0, window_bounds = array<i64: 8, 32>}, {pipeline_mode = #tpu.pipeline_mode<synchronous>, transform_indices = @transform_1, window_bounds = array<i64: 3, 128>}, {pipeline_mode = #tpu.pipeline_mode<synchronous>, transform_indices = @transform_2, window_bounds = array<i64: 3, 128, 128>}, {transform_indices = @transform_3, window_bounds = array<i64: 8, 8>}]} {
    %c0 = arith.constant 0 : index
    %c0_0 = arith.constant 0 : index
    %0 = vector.load %arg2[%c0, %c0_0] : memref<3x128xf32, #tpu.memory_space<vmem>>, vector<1x128xf32>
    %c1 = arith.constant 1 : index
    %c0_1 = arith.constant 0 : index
    %1 = vector.load %arg2[%c1, %c0_1] : memref<3x128xf32, #tpu.memory_space<vmem>>, vector<1x128xf32>
    %c2 = arith.constant 2 : index
    %c0_2 = arith.constant 0 : index
    %2 = vector.load %arg2[%c2, %c0_2] : memref<3x128xf32, #tpu.memory_space<vmem>>, vector<1x128xf32>
    %c0_3 = arith.constant 0 : index
    %c0_4 = arith.constant 0 : index
    %3 = vector.load %arg1[%c0_3, %c0_4] : memref<8x32xf32, #tpu.memory_space<vmem>>, vector<8x32xf32>
    %cst = arith.constant dense<0.000000e+00> : vector<8xf32>
    %4 = vector.multi_reduction <add>, %3, %cst [1] : vector<8x32xf32> to vector<8xf32>
    %5 = vector.shape_cast %4 : vector<8xf32> to vector<8x1xf32>
    %cst_5 = arith.constant 3.200000e+01 : f32
    %6 = vector.broadcast %cst_5 : f32 to vector<8x1xf32>
    %7 = arith.divf %5, %6 : vector<8x1xf32>
    %8 = arith.mulf %3, %3 : vector<8x32xf32>
    %cst_6 = arith.constant dense<0.000000e+00> : vector<8xf32>
    %9 = vector.multi_reduction <add>, %8, %cst_6 [1] : vector<8x32xf32> to vector<8xf32>
    %10 = vector.shape_cast %9 : vector<8xf32> to vector<8x1xf32>
    %cst_7 = arith.constant 3.200000e+01 : f32
    %11 = vector.broadcast %cst_7 : f32 to vector<8x1xf32>
    %12 = arith.divf %10, %11 : vector<8x1xf32>
    %13 = arith.mulf %7, %7 : vector<8x1xf32>
    %14 = arith.subf %12, %13 : vector<8x1xf32>
    %cst_8 = arith.constant 0.000000e+00 : f32
    %15 = vector.broadcast %cst_8 : f32 to vector<8x1xf32>
    %16 = arith.maximumf %14, %15 : vector<8x1xf32>
    %17 = vector.broadcast %7 : vector<8x1xf32> to vector<8x32xf32>
    %18 = arith.subf %3, %17 : vector<8x32xf32>
    %cst_9 = arith.constant 9.99999974E-6 : f32
    %19 = vector.broadcast %cst_9 : f32 to vector<8x1xf32>
    %20 = arith.addf %16, %19 : vector<8x1xf32>
    %21 = math.rsqrt %20 : vector<8x1xf32>
    %22 = vector.broadcast %21 : vector<8x1xf32> to vector<8x32xf32>
    %23 = arith.mulf %18, %22 : vector<8x32xf32>
    %24 = arith.truncf %23 : vector<8x32xf32> to vector<8x32xbf16>
    %c0_10 = arith.constant 0 : index
    %c0_11 = arith.constant 0 : index
    %c0_12 = arith.constant 0 : index
    %25 = vector.load %arg3[%c0_10, %c0_11, %c0_12] : memref<3x128x128xbf16, #tpu.memory_space<vmem>>, vector<1x128x128xbf16>
    %26 = vector.shape_cast %25 : vector<1x128x128xbf16> to vector<128x128xbf16>
    %27 = vector.extract_strided_slice %26 {offsets = [0, 0], sizes = [32, 128], strides = [1, 1]} : vector<128x128xbf16> to vector<32x128xbf16>
    %cst_13 = arith.constant dense<0.000000e+00> : vector<8x128xf32>
    %28 = tpu.matmul %24, %27, %cst_13 {dimension_numbers = #tpu.dot_dimension_numbers<[1], [0], [0], [1], [0, 0, 1, 1], [], []>} : vector<8x32xbf16>, vector<32x128xbf16>, vector<8x128xf32> -> vector<8x128xf32>
    %29 = vector.broadcast %0 : vector<1x128xf32> to vector<8x128xf32>
    %30 = arith.addf %28, %29 : vector<8x128xf32>
    %31 = math.tanh %30 : vector<8x128xf32>
    %cst_14 = arith.constant dense<0.000000e+00> : vector<8xf32>
    %32 = vector.multi_reduction <add>, %31, %cst_14 [1] : vector<8x128xf32> to vector<8xf32>
    %33 = vector.shape_cast %32 : vector<8xf32> to vector<8x1xf32>
    %cst_15 = arith.constant 1.280000e+02 : f32
    %34 = vector.broadcast %cst_15 : f32 to vector<8x1xf32>
    %35 = arith.divf %33, %34 : vector<8x1xf32>
    %36 = arith.mulf %31, %31 : vector<8x128xf32>
    %cst_16 = arith.constant dense<0.000000e+00> : vector<8xf32>
    %37 = vector.multi_reduction <add>, %36, %cst_16 [1] : vector<8x128xf32> to vector<8xf32>
    %38 = vector.shape_cast %37 : vector<8xf32> to vector<8x1xf32>
    %cst_17 = arith.constant 1.280000e+02 : f32
    %39 = vector.broadcast %cst_17 : f32 to vector<8x1xf32>
    %40 = arith.divf %38, %39 : vector<8x1xf32>
    %41 = arith.mulf %35, %35 : vector<8x1xf32>
    %42 = arith.subf %40, %41 : vector<8x1xf32>
    %cst_18 = arith.constant 0.000000e+00 : f32
    %43 = vector.broadcast %cst_18 : f32 to vector<8x1xf32>
    %44 = arith.maximumf %42, %43 : vector<8x1xf32>
    %45 = vector.broadcast %35 : vector<8x1xf32> to vector<8x128xf32>
    %46 = arith.subf %31, %45 : vector<8x128xf32>
    %cst_19 = arith.constant 9.99999974E-6 : f32
    %47 = vector.broadcast %cst_19 : f32 to vector<8x1xf32>
    %48 = arith.addf %44, %47 : vector<8x1xf32>
    %49 = math.rsqrt %48 : vector<8x1xf32>
    %50 = vector.broadcast %49 : vector<8x1xf32> to vector<8x128xf32>
    %51 = arith.mulf %46, %50 : vector<8x128xf32>
    %52 = arith.truncf %51 : vector<8x128xf32> to vector<8x128xbf16>
    %c1_20 = arith.constant 1 : index
    %c0_21 = arith.constant 0 : index
    %c0_22 = arith.constant 0 : index
    %53 = vector.load %arg3[%c1_20, %c0_21, %c0_22] : memref<3x128x128xbf16, #tpu.memory_space<vmem>>, vector<1x128x128xbf16>
    %54 = vector.shape_cast %53 : vector<1x128x128xbf16> to vector<128x128xbf16>
    %cst_23 = arith.constant dense<0.000000e+00> : vector<8x128xf32>
    %55 = tpu.matmul %52, %54, %cst_23 {dimension_numbers = #tpu.dot_dimension_numbers<[1], [0], [0], [1], [0, 0, 1, 1], [], []>} : vector<8x128xbf16>, vector<128x128xbf16>, vector<8x128xf32> -> vector<8x128xf32>
    %56 = vector.broadcast %1 : vector<1x128xf32> to vector<8x128xf32>
    %57 = arith.addf %55, %56 : vector<8x128xf32>
    %58 = math.tanh %57 : vector<8x128xf32>
    %cst_24 = arith.constant dense<0.000000e+00> : vector<8xf32>
    %59 = vector.multi_reduction <add>, %58, %cst_24 [1] : vector<8x128xf32> to vector<8xf32>
    %60 = vector.shape_cast %59 : vector<8xf32> to vector<8x1xf32>
    %cst_25 = arith.constant 1.280000e+02 : f32
    %61 = vector.broadcast %cst_25 : f32 to vector<8x1xf32>
    %62 = arith.divf %60, %61 : vector<8x1xf32>
    %63 = arith.mulf %58, %58 : vector<8x128xf32>
    %cst_26 = arith.constant dense<0.000000e+00> : vector<8xf32>
    %64 = vector.multi_reduction <add>, %63, %cst_26 [1] : vector<8x128xf32> to vector<8xf32>
    %65 = vector.shape_cast %64 : vector<8xf32> to vector<8x1xf32>
    %cst_27 = arith.constant 1.280000e+02 : f32
    %66 = vector.broadcast %cst_27 : f32 to vector<8x1xf32>
    %67 = arith.divf %65, %66 : vector<8x1xf32>
    %68 = arith.mulf %62, %62 : vector<8x1xf32>
    %69 = arith.subf %67, %68 : vector<8x1xf32>
    %cst_28 = arith.constant 0.000000e+00 : f32
    %70 = vector.broadcast %cst_28 : f32 to vector<8x1xf32>
    %71 = arith.maximumf %69, %70 : vector<8x1xf32>
    %72 = vector.broadcast %62 : vector<8x1xf32> to vector<8x128xf32>
    %73 = arith.subf %58, %72 : vector<8x128xf32>
    %cst_29 = arith.constant 9.99999974E-6 : f32
    %74 = vector.broadcast %cst_29 : f32 to vector<8x1xf32>
    %75 = arith.addf %71, %74 : vector<8x1xf32>
    %76 = math.rsqrt %75 : vector<8x1xf32>
    %77 = vector.broadcast %76 : vector<8x1xf32> to vector<8x128xf32>
    %78 = arith.mulf %73, %77 : vector<8x128xf32>
    %79 = arith.truncf %78 : vector<8x128xf32> to vector<8x128xbf16>
    %c2_30 = arith.constant 2 : index
    %c0_31 = arith.constant 0 : index
    %c0_32 = arith.constant 0 : index
    %80 = vector.load %arg3[%c2_30, %c0_31, %c0_32] : memref<3x128x128xbf16, #tpu.memory_space<vmem>>, vector<1x128x128xbf16>
    %81 = vector.shape_cast %80 : vector<1x128x128xbf16> to vector<128x128xbf16>
    %cst_33 = arith.constant dense<0.000000e+00> : vector<8x128xf32>
    %82 = tpu.matmul %79, %81, %cst_33 {dimension_numbers = #tpu.dot_dimension_numbers<[1], [0], [0], [1], [0, 0, 1, 1], [], []>} : vector<8x128xbf16>, vector<128x128xbf16>, vector<8x128xf32> -> vector<8x128xf32>
    %83 = vector.broadcast %2 : vector<1x128xf32> to vector<8x128xf32>
    %84 = arith.addf %82, %83 : vector<8x128xf32>
    %85 = math.tanh %84 : vector<8x128xf32>
    %86 = vector.extract_strided_slice %85 {offsets = [0, 0], sizes = [8, 8], strides = [1, 1]} : vector<8x128xf32> to vector<8x8xf32>
    %87 = arith.truncf %86 : vector<8x8xf32> to vector<8x8xbf16>
    %c0_34 = arith.constant 0 : index
    %c0_35 = arith.constant 0 : index
    %88 = vector.load %arg4[%c0_34, %c0_35] : memref<8x8xbf16, #tpu.memory_space<vmem>>, vector<8x8xbf16>
    tpu.vector_store %arg4[%c0_34, %c0_35], %87 {strides = array<i32>} : memref<8x8xbf16, #tpu.memory_space<vmem>>, vector<8x8xbf16>,
    return
  }
  func.func @transform_0(%arg0: i32) -> (i32, i32) {
    %c0_i32 = arith.constant 0 : i32
    %c0_i32_0 = arith.constant 0 : i32
    return %arg0, %c0_i32 : i32, i32
  }
  func.func @transform_1(%arg0: i32) -> (i32, i32) {
    %c0_i32 = arith.constant 0 : i32
    %c0_i32_0 = arith.constant 0 : i32
    %c0_i32_1 = arith.constant 0 : i32
    return %c0_i32, %c0_i32_0 : i32, i32
  }
  func.func @transform_2(%arg0: i32) -> (i32, i32, i32) {
    %c0_i32 = arith.constant 0 : i32
    %c0_i32_0 = arith.constant 0 : i32
    %c0_i32_1 = arith.constant 0 : i32
    %c0_i32_2 = arith.constant 0 : i32
    return %c0_i32, %c0_i32_0, %c0_i32_1 : i32, i32, i32
  }
  func.func @transform_3(%arg0: i32) -> (i32, i32) {
    %c0_i32 = arith.constant 0 : i32
    %c0_i32_0 = arith.constant 0 : i32
    return %arg0, %c0_i32 : i32, i32
  }
}

</mosaic_0001>

<bundles_post_ra>
// kernel: tpu_custom_call.1
= control target key start
LH: loop header
LB: loop body
LE: loop exit
PB: predicated region body
PF: predicated region fallthrough
CT: control target
= control target key end

     0   :  { %8 = vsyncpa [#allocation3], 0  ;;  %s736_s0 = inlined_call_operand.hbm [shape: f32[8,32], index: 0, kind: input, shape index: {}]   ;;  %s737_s1 = inlined_call_operand.hbm [shape: f32[3,128], index: 1, kind: input, shape index: {}]   ;;  %s738_s2 = inlined_call_operand.hbm [shape: bf16[3,128,128], index: 2, kind: input, shape index: {}]   ;;  %s739_s3 = inlined_call_operand.hbm [shape: bf16[8,8], index: 3, kind: output, shape index: {}]  }
   0x1   :  { %9 = vsyncpa [#allocation6], 0 }
   0x2   :  { %10 = vsyncpa [#allocation4], 0  ;;  %s633_s12 = smov [#allocation5]   ;;  %s634_s14 = smov [#allocation2]  }
   0x3   :  { %s27_s13 = sshll.u32 %s633_s12, 4  ;;  %s17_s15 = sshll.u32 %s634_s14, 4  ;;  %s28_s13 = int_to_ptr.vmem [resolvable:$true] %s27_s13  ;;  %s18_s15 = int_to_ptr.vmem [resolvable:$true] %s17_s15 }
   0x4   :  { %s539_s18 = scalar_lea.hbm %s737_s1, 64 }
   0x5   :  { %p540_p0 = scmp.ne.s32.totalorder %s737_s1, %s539_s18  ;;  %p543_p1 = scmp.lt.u32.totalorder %s539_s18, %s737_s1 }
   0x7   :  { %p545_p2 = pnand %p543_p1, %p540_p0 }
   0x9   :  { %548 = shalt.err (!%p545_p2)
}
   0xa   :  { %s549_s23 = scalar_lea.vmem %s28_s13, 64  ;;  %p554_p4 = scmp.lt.s32.totalorder %s28_s13, %s28_s13 }
   0xb   :  { %p550_p3 = scmp.ne.s32.totalorder %s28_s13, %s549_s23  ;;  %p555_p5 = scmp.lt.s32.totalorder %s549_s23, %s549_s23 }
   0xd   :  { %p556_p6 = por %p555_p5, %p554_p4 }
   0xf   :  { %p557_p7 = pnand %p556_p6, %p550_p3 }
  0x11   :  { %560 = shalt.err (!%p557_p7)
}
  0x12   :  { %30 = dma.hbm_to_vmem [thread:$0]  %s737_s1, 64, %s28_s13, [#allocation6]  }
  0x13   :  { %s561_s28 = scalar_lea.hbm %s736_s0, 128 }
  0x14   :  { %p562_p8 = scmp.ne.s32.totalorder %s736_s0, %s561_s28  ;;  %p565_p9 = scmp.lt.u32.totalorder %s561_s28, %s736_s0 }
  0x16   :  { %p567_p10 = pnand %p565_p9, %p562_p8 }
  0x18   :  { %570 = shalt.err (!%p567_p10)
}
  0x19   :  { %s571_s6 = scalar_lea.vmem %s18_s15, 128  ;;  %p576_p12 = scmp.lt.s32.totalorder %s18_s15, %s18_s15 }
  0x1a   :  { %p572_p11 = scmp.ne.s32.totalorder %s18_s15, %s571_s6  ;;  %p577_p13 = scmp.lt.s32.totalorder %s571_s6, %s571_s6 }
  0x1c   :  { %p578_p0 = por %p577_p13, %p576_p12 }
  0x1e   :  { %p579_p1 = pnand %p578_p0, %p572_p11 }
  0x20   :  { %582 = shalt.err (!%p579_p1)
}
  0x21   :  { %20 = dma.hbm_to_vmem [thread:$0]  %s736_s0, 128, %s18_s15, [#allocation3]  }
  0x22   :  { %s635_s8 = smov [#allocation7]   ;;  %s583_s12 = scalar_lea.hbm %s738_s2, 3072 }
  0x23   :  { %s36_s9 = sshll.u32 %s635_s8, 4  ;;  %p584_p2 = scmp.ne.s32.totalorder %s738_s2, %s583_s12  ;;  %s37_s9 = int_to_ptr.vmem [resolvable:$true] %s36_s9 }
  0x24   :  { %p587_p3 = scmp.lt.u32.totalorder %s583_s12, %s738_s2 }
  0x26   :  { %p589_p4 = pnand %p587_p3, %p584_p2 }
  0x28   :  { %592 = shalt.err (!%p589_p4)
}
  0x29   :  { %s593_s18 = scalar_lea.vmem %s37_s9, 3072  ;;  %p598_p6 = scmp.lt.s32.totalorder %s37_s9, %s37_s9 }
  0x2a   :  { %p594_p5 = scmp.ne.s32.totalorder %s37_s9, %s593_s18  ;;  %p599_p7 = scmp.lt.s32.totalorder %s593_s18, %s593_s18 }
  0x2c   :  { %p600_p8 = por %p599_p7, %p598_p6 }
  0x2e   :  { %p601_p9 = pnand %p600_p8, %p594_p5 }
  0x30   :  { %604 = shalt.err (!%p601_p9)
}
  0x31   :  { %s636_s0 = smov 64   ;;  %s637_s15 = smov 4  }
  0x32   :  { %42 = dma.hbm_to_vmem [thread:$0]  %s738_s2, 3072, %s37_s9, [#allocation6], %s636_s0, %s636_s0, %s637_s15  }
  0x33   :  { %627 = dma.done.wait [#allocation3], 128  }
  0x34   :  { %628 = vsyncadd [#allocation3], 4294967168 }
  0x35   :  { %629 = dma.done.wait [#allocation6], 3136  }
  0x36   :  { %630 = vsyncadd [#allocation6], 4294964160  ;;  %vm57_vm0 = vcmask 261120   ;;  %v56_v0 = vld [vmem:[#allocation2] sm:$0xff]  ;;  %v509_v4 = vld [vmem:[#allocation7] sm:$0xff]   ;;  %v638_v5 = vmov 0.0  }
  0x37   :  { %v58_v1 = vsel %vm57_vm0, %v56_v0, 0.0  ;;  %v63_v2 = vmul.f32 %v56_v0, %v56_v0  ;;  %453 = vmatprep.subr.bf16.mxu0 %v638_v5  ;;  %vm639_vm1 = vmmov 0   ;;  %v510_v6 = vld [vmem:[#allocation7 + $0x8] sm:$0xff]   ;;  %461 = vmatprep.subr.bf16.mxu1 %v638_v5  ;;  %v511_v19 = vld [vmem:[#allocation7 + $0x40] sm:$0xff]   ;;  %v410_v20 = vld [vmem:[#allocation5] ss:$0 sm:$0xff] }
  0x38   :  { %59 = vadd.xlane.f32.xlu0 %v58_v1  ;;  %457 = vmatprep.mubr.msk.bf16.mxu0 %vm639_vm1, %v638_v5  ;;  %v512_v28 = vld [vmem:[#allocation7 + $0x48] sm:$0xff]   ;;  %v513_v29 = vld [vmem:[#allocation7 + $0x50] sm:$0xff]   ;;  %v514_v30 = vld [vmem:[#allocation7 + $0x58] sm:$0xff]   ;;  %s640_s2 = smov [#allocation8]   ;;  %vm392_vm2 = vcmask 60416  }
  0x39   :  { %v64_v3 = vsel %vm57_vm0, %v63_v2, 0.0  ;;  %454 = vmatpush3.bf16.msra.mxu0 %v509_v4  ;;  %477 = vmatprep.mubr.msk.bf16.mxu1 %vm639_vm1, %v638_v5  ;;  %v515_v31 = vld [vmem:[#allocation7 + $0x60] sm:$0xff]   ;;  %v516_v32 = vld [vmem:[#allocation7 + $0x68] sm:$0xff]   ;;  %v517_v33 = vld [vmem:[#allocation7 + $0x70] sm:$0xff]   ;;  %s400_s21 = sshll.u32 %s640_s2, 4  ;;  %s401_s21 = int_to_ptr.vmem [resolvable:$true] %s400_s21 }
  0x3a   :  { %455 = vmatprep.subr.bf16.mxu0 %v638_v5  ;;  %462 = vmatpush3.bf16.msra.mxu1 %v511_v19  ;;  %v518_v34 = vld [vmem:[#allocation7 + $0x78] sm:$0xff]   ;;  %v519_v47 = vld [vmem:[#allocation7 + $0x80] sm:$0xff]   ;;  %v520_v48 = vld [vmem:[#allocation7 + $0x88] sm:$0xff]   ;;  %s605_s22 = scalar_lea.vmem %s401_s21, 64  ;;  %p610_p11 = scmp.lt.s32.totalorder %s401_s21, %s401_s21 }
  0x3b   :  { %463 = vmatprep.subr.bf16.mxu1 %v638_v5  ;;  %v414_v49 = vld [vmem:[#allocation5 + $0x1] ss:$0 sm:$0xff]  ;;  %v521_v57 = vld [vmem:[#allocation7 + $0x90] sm:$0xff]   ;;  %v523_v59 = vld [vmem:[#allocation7 + $0xa0] sm:$0xff]   ;;  %p606_p10 = scmp.ne.s32.totalorder %s401_s21, %s605_s22  ;;  %p611_p12 = scmp.lt.s32.totalorder %s605_s22, %s605_s22 }
  0x3c   :  { %65 = vadd.xlane.f32.xlu0 %v64_v3  ;;  %v522_v58 = vld [vmem:[#allocation7 + $0x98] sm:$0xff]   ;;  %v524_v60 = vld [vmem:[#allocation7 + $0xa8] sm:$0xff]   ;;  %v525_v61 = vld [vmem:[#allocation7 + $0xb0] sm:$0xff]  }
  0x3d   :  { %456 = vmatpush3.bf16.msra.mxu0 %v510_v6  ;;  %v526_v62 = vld [vmem:[#allocation7 + $0xb8] sm:$0xff]   ;;  %p612_p13 = por %p611_p12, %p610_p11 }
  0x3e   :  { %481 = vmatprep.subr.bf16.mxu0 %v638_v5  ;;  %464 = vmatpush3.bf16.msra.mxu1 %v512_v28 }
  0x3f   :  { %465 = vmatprep.subr.bf16.mxu1 %v638_v5  ;;  %p613_p0 = pnand %p612_p13, %p606_p10 }
  0x42   :  { %466 = vmatpush3.bf16.msra.mxu1 %v513_v29 }
  0x43   :  { %467 = vmatprep.subr.bf16.mxu1 %v638_v5 }
  0x46   :  { %468 = vmatpush3.bf16.msra.mxu1 %v514_v30 }
  0x47   :  { %469 = vmatprep.subr.bf16.mxu1 %v638_v5 }
  0x4a   :  { %470 = vmatpush3.bf16.msra.mxu1 %v515_v31 }
  0x4b   :  { %471 = vmatprep.subr.bf16.mxu1 %v638_v5 }
  0x4e   :  { %472 = vmatpush3.bf16.msra.mxu1 %v516_v32 }
  0x4f   :  { %473 = vmatprep.subr.bf16.mxu1 %v638_v5 }
  0x52   :  { %474 = vmatpush3.bf16.msra.mxu1 %v517_v33 }
  0x53   :  { %475 = vmatprep.subr.bf16.mxu1 %v638_v5 }
  0x56   :  { %476 = vmatpush3.bf16.msra.mxu1 %v518_v34 }
  0xc5   :  { %v60_v7 = vpop.xlane.xlu0 %59 }
  0xc6   :  { %v62_v8 = vmul.f32 0.03125, %v60_v7 }
  0xc8   :  { %v68_v10 = vmul.f32 %v62_v8, %v62_v8  ;;  %v71_v15 = vsub.f32 %v56_v0, %v62_v8 }
  0xc9   :  { %v66_v9 = vpop.xlane.xlu0 %65 }
  0xca   :  { %v67_v11 = vmul.f32 0.03125, %v66_v9 }
  0xcc   :  { %v69_v12 = vsub.f32 %v67_v11, %v68_v10 }
  0xce   :  { %v70_v13 = vmax.f32 %v69_v12, 0.0  ;;  %v423_v12 = vld [vmem:[#allocation5 + $0x2] ss:$0 sm:$0xff] }
  0xd0   :  { %v72_v14 = vadd.f32 1e-05, %v70_v13 }
  0xd2   :  { %527 = vrsqrt.f32 %v72_v14 }
  0xdc   :  { %v528_v16 = vpop.eup %527 }
  0xdd   :  { %v74_v17 = vmul.f32 %v528_v16, %v71_v15 }
  0xdf   :  { %v75_v18 = vpack.c.bf16 %v74_v17, %v74_v17 }
  0xe1   :  { %458 = vmatmul.mubr.msk.bf16.vlgmr.msra.gmra.mrb[0].mxu0 %vm57_vm0, %v75_v18 }
  0xe2   :  { %497 = vmatprep.mubr.msk.bf16.mxu0 %vm639_vm1, %v638_v5  ;;  %482 = vmatpush3.bf16.msra.mxu0 %v519_v47 }
  0xe3   :  { %483 = vmatprep.subr.bf16.mxu0 %v638_v5 }
  0xe6   :  { %484 = vmatpush3.bf16.msra.mxu0 %v520_v48 }
  0xe7   :  { %485 = vmatprep.subr.bf16.mxu0 %v638_v5 }
  0xea   :  { %486 = vmatpush3.bf16.msra.mxu0 %v521_v57 }
  0xeb   :  { %487 = vmatprep.subr.bf16.mxu0 %v638_v5 }
  0xee   :  { %488 = vmatpush3.bf16.msra.mxu0 %v522_v58 }
  0xef   :  { %489 = vmatprep.subr.bf16.mxu0 %v638_v5 }
  0xf2   :  { %490 = vmatpush3.bf16.msra.mxu0 %v523_v59 }
  0xf3   :  { %491 = vmatprep.subr.bf16.mxu0 %v638_v5 }
  0xf6   :  { %492 = vmatpush3.bf16.msra.mxu0 %v524_v60 }
  0xf7   :  { %493 = vmatprep.subr.bf16.mxu0 %v638_v5 }
  0xfa   :  { %494 = vmatpush3.bf16.msra.mxu0 %v525_v61 }
  0xfb   :  { %495 = vmatprep.subr.bf16.mxu0 %v638_v5 }
  0xfe   :  { %496 = vmatpush3.bf16.msra.mxu0 %v526_v62 }
 0x1b4   :  { %v133_v21 = vpop.f32.mrb[0].mxu0 }
 0x1b5   :  { %v134_v22 = vadd.f32 %v410_v20, %v133_v21  ;;  %v459_v23 = vpop.f32.mrb[1].mxu0 }
 0x1b6   :  { %v136_v24 = vpop.f32.mrb[2].mxu0 }
 0x1b7   :  { %529 = vtanh.f32 %v134_v22  ;;  %v460_v25 = vpop.f32.mrb[3].mxu0 }
 0x1c1   :  { %v530_v26 = vpop.eup %529 }
 0x1c2   :  { %140 = vadd.xlane.f32.xlu1 %v530_v26  ;;  %v144_v27 = vmul.f32 %v530_v26, %v530_v26 }
 0x1c6   :  { %145 = vadd.xlane.f32.xlu1 %v144_v27 }
 0x24f   :  { %v141_v35 = vpop.xlane.xlu1 %140 }
 0x250   :  { %v143_v36 = vmul.f32 0.0078125, %v141_v35 }
 0x252   :  { %v148_v38 = vmul.f32 %v143_v36, %v143_v36  ;;  %v151_v43 = vsub.f32 %v530_v26, %v143_v36 }
 0x253   :  { %v146_v37 = vpop.xlane.xlu1 %145 }
 0x254   :  { %v147_v39 = vmul.f32 0.0078125, %v146_v37 }
 0x256   :  { %v149_v40 = vsub.f32 %v147_v39, %v148_v38 }
 0x258   :  { %v150_v41 = vmax.f32 %v149_v40, 0.0 }
 0x25a   :  { %v152_v42 = vadd.f32 1e-05, %v150_v41 }
 0x25c   :  { %531 = vrsqrt.f32 %v152_v42 }
 0x266   :  { %v532_v44 = vpop.eup %531 }
 0x267   :  { %v154_v45 = vmul.f32 %v532_v44, %v151_v43 }
 0x269   :  { %v155_v46 = vpack.c.bf16 %v154_v45, %v154_v45 }
 0x26b   :  { %478 = vmatmul.mubr.bf16.vlgmr.msra.gmra.mrb[0].mxu1 %v155_v46 }
 0x33e   :  { %v259_v50 = vpop.f32.mrb[0].mxu1 }
 0x33f   :  { %v260_v51 = vadd.f32 %v414_v49, %v259_v50  ;;  %v479_v52 = vpop.f32.mrb[1].mxu1 }
 0x340   :  { %v262_v53 = vpop.f32.mrb[2].mxu1 }
 0x341   :  { %533 = vtanh.f32 %v260_v51  ;;  %v480_v54 = vpop.f32.mrb[3].mxu1 }
 0x34b   :  { %v534_v55 = vpop.eup %533 }
 0x34c   :  { %266 = vadd.xlane.f32.xlu0 %v534_v55  ;;  %v269_v56 = vmul.f32 %v534_v55, %v534_v55 }
 0x34e   :  { %270 = vadd.xlane.f32.xlu1 %v269_v56 }
 0x3d9   :  { %v267_v63 = vpop.xlane.xlu0 %266 }
 0x3da   :  { %v268_v0 = vmul.f32 0.0078125, %v267_v63 }
 0x3db   :  { %v271_v1 = vpop.xlane.xlu1 %270 }
 0x3dc   :  { %v273_v2 = vmul.f32 %v268_v0, %v268_v0  ;;  %v272_v3 = vmul.f32 0.0078125, %v271_v1  ;;  %v276_v8 = vsub.f32 %v534_v55, %v268_v0 }
 0x3de   :  { %v274_v4 = vsub.f32 %v272_v3, %v273_v2 }
 0x3e0   :  { %v275_v6 = vmax.f32 %v274_v4, 0.0 }
 0x3e2   :  { %v277_v7 = vadd.f32 1e-05, %v275_v6 }
 0x3e4   :  { %535 = vrsqrt.f32 %v277_v7 }
 0x3ee   :  { %v536_v9 = vpop.eup %535 }
 0x3ef   :  { %v279_v10 = vmul.f32 %v536_v9, %v276_v8 }
 0x3f1   :  { %v280_v11 = vpack.c.bf16 %v279_v10, %v279_v10 }
 0x3f3   :  { %498 = vmatmul.mubr.bf16.vlgmr.msra.gmra.mrb[4].mxu0 %v280_v11 }
 0x4c6   :  { %v384_v13 = vpop.f32.mrb[4].mxu0 }
 0x4c7   :  { %v385_v14 = vadd.f32 %v423_v12, %v384_v13  ;;  %v499_v15 = vpop.f32.mrb[5].mxu0 }
 0x4c8   :  { %v387_v5 = vpop.f32.mrb[6].mxu0 }
 0x4c9   :  { %537 = vtanh.f32 %v385_v14  ;;  %v500_v16 = vpop.f32.mrb[7].mxu0 }
 0x4d3   :  { %v538_v17 = vpop.eup %537 }
 0x4d4   :  { %v391_v18 = vpack.c.bf16 %v538_v17, %v538_v17 }
 0x4d6   :  { %393 = vst.msk [vmem:[#allocation8] sm:$0xf] %vm392_vm2, %v391_v18 }
 0x4d7   :  { %616 = shalt.err (!%p613_p0)
}
 0x4d8   :  { %s617_s25 = scalar_lea.hbm %s739_s3, 64 }
 0x4d9   :  { %p618_p1 = scmp.ne.s32.totalorder %s739_s3, %s617_s25  ;;  %p621_p2 = scmp.lt.u32.totalorder %s617_s25, %s739_s3 }
 0x4db   :  { %p623_p3 = pnand %p621_p2, %p618_p1 }
 0x4dd   :  { %626 = shalt.err (!%p623_p3)
}
 0x4de   :  { %403 = dma.vmem_to_hbm [thread:$0]  %s401_s21, 64, %s739_s3, [#allocation4]  }
 0x4df   :  { %631 = dma.done.wait [#allocation4], 64  }
 0x4e0   :  { %632 = vsyncadd [#allocation4], 4294967232 }
 0x4e1   :  { %407 = vsyncpa [#allocation3], 1 }
 0x4e2   :  { %408 = vsyncpa [#allocation6], 1 }
 0x4e3   :  { %409 = vsyncpa [#allocation4], 1 }

</bundles_post_ra>
